<compile_context>
chip_gen: v6e
topology: v6e:2x2x1
jax: 0.10.0
libtpu: 0.0.40
codegen_flags: <defaults>
</compile_context>

<pallas_src>
import functools

import jax
import jax.numpy as jnp
from jax.experimental import pallas as pl
from jax.experimental.pallas import tpu as pltpu


def _lrpad3d_kernel(x_ref, o_ref, *, pt, ph, pw, T, H, W):
    # x_ref: (B, T, H, W) block of merged (n, c) slices
    # o_ref: (B, T+2pt, H+2ph, W+2pw) output block
    B = x_ref.shape[0]
    Wo = W + 2 * pw
    Ho = H + 2 * ph

    x = x_ref[...]                                            # (B, T, H, W)
    if pw > 0:
        # Circular (wrap-around) padding along W.
        x = jnp.concatenate([x[..., W - pw:], x, x[..., :pw]], axis=-1)  # (B,T,H,Wo)

    dt = o_ref.dtype
    # Zero only the halo regions (static Python branches compile away when pad == 0).
    if pt > 0:
        o_ref[:, pl.ds(0, pt), :, :] = jnp.zeros((B, pt, Ho, Wo), dt)
        o_ref[:, pl.ds(pt + T, pt), :, :] = jnp.zeros((B, pt, Ho, Wo), dt)
    if ph > 0:
        o_ref[:, pl.ds(pt, T), pl.ds(0, ph), :] = jnp.zeros((B, T, ph, Wo), dt)
        o_ref[:, pl.ds(pt, T), pl.ds(ph + H, ph), :] = jnp.zeros((B, T, ph, Wo), dt)
    # Interior (already circularly padded along W) — stored exactly once.
    o_ref[:, pl.ds(pt, T), pl.ds(ph, H), :] = x.astype(dt)


def _choose_batch_block(nc, pair_bytes):
    """Largest divisor of nc whose (input + output) block stays within a
    conservative single-buffered VMEM budget; stop growing once the block
    reaches ~2 MiB so large tensors still produce several grid steps
    (keeps both v7x TensorCores busy and the pipeline full)."""
    budget = 6 * 1024 * 1024   # x2 double-buffering ~= 12 MiB, safe on v5e/v6e/v7x defaults
    target = 2 * 1024 * 1024
    best = 1
    for b in range(1, nc + 1):
        if b * pair_bytes > budget:
            break
        if nc % b != 0:
            continue
        best = b
        if b * pair_bytes >= target:
            break
    return best


def lr_pad3d(x, padding):
    """Pallas TPU implementation of LRPad3d.forward for a 5-D NCTHW tensor.

    padding = (t, h, w) [or a single int]: circular pad of w on each side of W,
    then zero pad of h on each side of H and t on each side of T.
    NOTE: this order is (t, h, w), NOT the raw F.pad (w, w, h, h, t, t) tuple.
    """
    if isinstance(padding, int):
        pt = ph = pw = padding
    else:
        pt, ph, pw = int(padding[0]), int(padding[1]), int(padding[2])

    N, C, T, H, W = x.shape
    if ph == 0 and pw == 0:
        # Matches the PyTorch module exactly: no padding at all in this case.
        return x

    assert pt >= 0 and ph >= 0 and pw >= 0, "padding must be non-negative"
    assert pw <= W, "circular W padding requires pw <= W"

    To, Ho, Wo = T + 2 * pt, H + 2 * ph, W + 2 * pw
    NC = N * C
    x2 = x.reshape(NC, T, H, W)

    itemsize = jnp.dtype(x.dtype).itemsize
    pair_bytes = (T * H * W + To * Ho * Wo) * itemsize
    Bblk = _choose_batch_block(NC, pair_bytes)
    grid = (NC // Bblk,)

    kernel = functools.partial(_lrpad3d_kernel, pt=pt, ph=ph, pw=pw, T=T, H=H, W=W)

    out = pl.pallas_call(
        kernel,
        out_shape=jax.ShapeDtypeStruct((NC, To, Ho, Wo), x.dtype),
        grid_spec=pltpu.PrefetchScalarGridSpec(
            num_scalar_prefetch=0,
            grid=grid,
            # Last two block dims equal the full array dims -> (8,128) constraint OK.
            in_specs=[pl.BlockSpec((Bblk, T, H, W), lambda b: (b, 0, 0, 0))],
            out_specs=pl.BlockSpec((Bblk, To, Ho, Wo), lambda b: (b, 0, 0, 0)),
        ),
        compiler_params=pltpu.CompilerParams(
            dimension_semantics=("parallel",),
        ),
        cost_estimate=pl.CostEstimate(
            flops=0,
            transcendentals=0,
            bytes_accessed=int(NC * pair_bytes),
        ),
    )(x2)

    return out.reshape(N, C, To, Ho, Wo)


def _ref_lrpad3d(x, padding):
    """Pure-jnp reference with the same semantics as the PyTorch module."""
    if isinstance(padding, int):
        pt = ph = pw = padding
    else:
        pt, ph, pw = padding
    if ph == 0 and pw == 0:
        return x
    W = x.shape[-1]
    if pw > 0:
        x = jnp.concatenate([x[..., W - pw:], x, x[..., :pw]], axis=-1)
    return jnp.pad(x, ((0, 0), (0, 0), (pt, pt), (ph, ph), (0, 0)))


if __name__ == "__main__":
    key = jax.random.PRNGKey(0)
    # Small NCTHW input: batch=2, channels=4, T=6, H=8, W=8
    x = jax.random.normal(key, (2, 4, 6, 8, 8), dtype=jnp.float32)

    for padding in [(1, 2, 3), (1, 2, 0), (2, 0, 0)]:
        y = jax.block_until_ready(lr_pad3d(x, padding))
        y_ref = _ref_lrpad3d(x, padding)
        assert y.shape == y_ref.shape, (padding, y.shape, y_ref.shape)
        assert jnp.array_equal(y, y_ref), f"mismatch vs reference for padding={padding}"

    print("KERNEL_OK")
</pallas_src>

<mosaic_0001>
module attributes {stable_mosaic.version = 11 : i64} {
  func.func @_lrpad3d_kernel(%arg0: i32, %arg1: memref<8x6x8x8xf32, #tpu.memory_space<vmem>>, %arg2: memref<8x8x12x14xf32, #tpu.memory_space<vmem>>) attributes {dimension_semantics = [#tpu.dimension_semantics<parallel>], iteration_bounds = array<i64: 1>, scalar_prefetch = 0 : i64, scratch_operands = 0 : i64, tpu.core_type = #tpu.core_type<tc>, window_params = [{transform_indices = @transform_0, window_bounds = array<i64: 8, 6, 8, 8>}, {transform_indices = @transform_1, window_bounds = array<i64: 8, 8, 12, 14>}]} {
    %c0 = arith.constant 0 : index
    %c0_0 = arith.constant 0 : index
    %c0_1 = arith.constant 0 : index
    %c0_2 = arith.constant 0 : index
    %0 = vector.load %arg1[%c0, %c0_0, %c0_1, %c0_2] : memref<8x6x8x8xf32, #tpu.memory_space<vmem>>, vector<8x6x8x8xf32>
    %1 = vector.extract_strided_slice %0 {offsets = [0, 0, 0, 5], sizes = [8, 6, 8, 3], strides = [1, 1, 1, 1]} : vector<8x6x8x8xf32> to vector<8x6x8x3xf32>
    %2 = vector.extract_strided_slice %0 {offsets = [0, 0, 0, 0], sizes = [8, 6, 8, 3], strides = [1, 1, 1, 1]} : vector<8x6x8x8xf32> to vector<8x6x8x3xf32>
    %3 = tpu.concatenate %1, %0, %2 in 3 : vector<8x6x8x3xf32>, vector<8x6x8x8xf32>, vector<8x6x8x3xf32> -> vector<8x6x8x14xf32>
    %cst = arith.constant 0.000000e+00 : f32
    %4 = vector.broadcast %cst : f32 to vector<8x1x12x14xf32>
    %c0_3 = arith.constant 0 : index
    %c0_4 = arith.constant 0 : index
    %c0_5 = arith.constant 0 : index
    %c0_6 = arith.constant 0 : index
    %5 = vector.load %arg2[%c0_3, %c0_4, %c0_5, %c0_6] : memref<8x8x12x14xf32, #tpu.memory_space<vmem>>, vector<8x1x12x14xf32>
    tpu.vector_store %arg2[%c0_3, %c0_4, %c0_5, %c0_6], %4 {strides = array<i32>} : memref<8x8x12x14xf32, #tpu.memory_space<vmem>>, vector<8x1x12x14xf32>,
    %cst_7 = arith.constant 0.000000e+00 : f32
    %6 = vector.broadcast %cst_7 : f32 to vector<8x1x12x14xf32>
    %c0_8 = arith.constant 0 : index
    %c7 = arith.constant 7 : index
    %c0_9 = arith.constant 0 : index
    %c0_10 = arith.constant 0 : index
    %7 = vector.load %arg2[%c0_8, %c7, %c0_9, %c0_10] : memref<8x8x12x14xf32, #tpu.memory_space<vmem>>, vector<8x1x12x14xf32>
    tpu.vector_store %arg2[%c0_8, %c7, %c0_9, %c0_10], %6 {strides = array<i32>} : memref<8x8x12x14xf32, #tpu.memory_space<vmem>>, vector<8x1x12x14xf32>,
    %cst_11 = arith.constant 0.000000e+00 : f32
    %8 = vector.broadcast %cst_11 : f32 to vector<8x6x2x14xf32>
    %c0_12 = arith.constant 0 : index
    %c1 = arith.constant 1 : index
    %c0_13 = arith.constant 0 : index
    %c0_14 = arith.constant 0 : index
    %9 = vector.load %arg2[%c0_12, %c1, %c0_13, %c0_14] : memref<8x8x12x14xf32, #tpu.memory_space<vmem>>, vector<8x6x2x14xf32>
    tpu.vector_store %arg2[%c0_12, %c1, %c0_13, %c0_14], %8 {strides = array<i32>} : memref<8x8x12x14xf32, #tpu.memory_space<vmem>>, vector<8x6x2x14xf32>,
    %cst_15 = arith.constant 0.000000e+00 : f32
    %10 = vector.broadcast %cst_15 : f32 to vector<8x6x2x14xf32>
    %c0_16 = arith.constant 0 : index
    %c1_17 = arith.constant 1 : index
    %c10 = arith.constant 10 : index
    %c0_18 = arith.constant 0 : index
    %11 = vector.load %arg2[%c0_16, %c1_17, %c10, %c0_18] : memref<8x8x12x14xf32, #tpu.memory_space<vmem>>, vector<8x6x2x14xf32>
    tpu.vector_store %arg2[%c0_16, %c1_17, %c10, %c0_18], %10 {strides = array<i32>} : memref<8x8x12x14xf32, #tpu.memory_space<vmem>>, vector<8x6x2x14xf32>,
    %c0_19 = arith.constant 0 : index
    %c1_20 = arith.constant 1 : index
    %c2 = arith.constant 2 : index
    %c0_21 = arith.constant 0 : index
    %12 = vector.load %arg2[%c0_19, %c1_20, %c2, %c0_21] : memref<8x8x12x14xf32, #tpu.memory_space<vmem>>, vector<8x6x8x14xf32>
    tpu.vector_store %arg2[%c0_19, %c1_20, %c2, %c0_21], %3 {strides = array<i32>} : memref<8x8x12x14xf32, #tpu.memory_space<vmem>>, vector<8x6x8x14xf32>,
    return
  }
  func.func @transform_0(%arg0: i32) -> (i32, i32, i32, i32) {
    %c0_i32 = arith.constant 0 : i32
    %c0_i32_0 = arith.constant 0 : i32
    %c0_i32_1 = arith.constant 0 : i32
    %c0_i32_2 = arith.constant 0 : i32
    return %arg0, %c0_i32, %c0_i32_0, %c0_i32_1 : i32, i32, i32, i32
  }
  func.func @transform_1(%arg0: i32) -> (i32, i32, i32, i32) {
    %c0_i32 = arith.constant 0 : i32
    %c0_i32_0 = arith.constant 0 : i32
    %c0_i32_1 = arith.constant 0 : i32
    %c0_i32_2 = arith.constant 0 : i32
    return %arg0, %c0_i32, %c0_i32_0, %c0_i32_1 : i32, i32, i32, i32
  }
}

</mosaic_0001>

<bundles_post_ra>
// kernel: tpu_custom_call.1
= control target key start
LH: loop header
LB: loop body
LE: loop exit
PB: predicated region body
PF: predicated region fallthrough
CT: control target
= control target key end

     0   :  { %6 = vsyncpa [#allocation3], 0  ;;  %s1023_s6 = smov [#allocation2]   ;;  %s2643_s0 = inlined_call_operand.hbm [shape: f32[8,6,8,8], index: 0, kind: input, shape index: {}]   ;;  %s2644_s1 = inlined_call_operand.vmem [shape: f32[8,8,12,14], index: 1, kind: output, shape index: {}]  }
   0x1   :  { %s12_s7 = sshll.u32 %s1023_s6, 4  ;;  %s13_s7 = int_to_ptr.vmem [resolvable:$true] %s12_s7 }
   0x2   :  { %s1009_s8 = scalar_lea.vmem %s13_s7, 6144  ;;  %p1014_p1 = scmp.lt.s32.totalorder %s13_s7, %s13_s7 }
   0x3   :  { %p1010_p0 = scmp.ne.s32.totalorder %s13_s7, %s1009_s8  ;;  %p1015_p2 = scmp.lt.s32.totalorder %s1009_s8, %s1009_s8 }
   0x5   :  { %p1016_p3 = por %p1015_p2, %p1014_p1 }
   0x7   :  { %p1017_p4 = pnand %p1016_p3, %p1010_p0 }
   0x9   :  { %1020 = shalt.err (!%p1017_p4)
}
   0xa   :  { %s1024_s9 = smov 128   ;;  %s1025_s10 = smov 8  }
   0xb   :  { %18 = dma.hbm_to_vmem [thread:$0]  %s2643_s0, 6144, %s13_s7, [#allocation3], %s1024_s9, %s1024_s9, %s1025_s10  }
   0xc   :  { %1021 = dma.done.wait [#allocation3], 6144  }
   0xd   :  { %1022 = vsyncadd [#allocation3], 4294961152  ;;  %vm648_vm0 = vcmask 113664   ;;  %vm650_vm1 = vcmask 109568   ;;  %vm684_vm2 = vcmask 107520   ;;  %v1026_v0 = vmov 0.0  }
   0xe   :  { %649 = vst.msk [vmem:[%s2644_s1] sm:$0xff] %vm648_vm0, %v1026_v0  ;;  %652 = vst.msk [vmem:[%s2644_s1 + $0x80] sm:$0xff] %vm648_vm0, %v1026_v0  ;;  %v1683_v1 = vld [vmem:[#allocation2 + $0x10] sm:$0xff]  ;;  %v1685_v2 = vld [vmem:[#allocation2] sm:$0xff]  ;;  %s1027_s28 = smov 123   ;;  %s1028_s29 = smov 3  }
   0xf   :  { %651 = vst.msk [vmem:[%s2644_s1 + $0x8] sm:$0xf] %vm650_vm1, %v1026_v0  ;;  %653 = vst.msk [vmem:[%s2644_s1 + $0x88] sm:$0xf] %vm650_vm1, %v1026_v0  ;;  %122 = vrot.lane.b32.xlu1 %v1683_v1, %s1027_s28  ;;  %118 = vrot.lane.b32.xlu0 %v1685_v2, %s1027_s28  ;;  %v1691_v3 = vld [vmem:[#allocation2 + $0x18] sm:$0xff]  ;;  %v1693_v4 = vld [vmem:[#allocation2 + $0x8] sm:$0xff] }
  0x10   :  { %654 = vst.msk [vmem:[%s2644_s1 + $0x100] sm:$0xff] %vm648_vm0, %v1026_v0  ;;  %656 = vst.msk [vmem:[%s2644_s1 + $0x180] sm:$0xff] %vm648_vm0, %v1026_v0  ;;  %v1699_v5 = vld [vmem:[#allocation2 + $0x28] sm:$0xff]  ;;  %v1701_v6 = vld [vmem:[#allocation2 + $0x20] sm:$0xff]  ;;  %s1029_s30 = smov 11   ;;  %vm550_vm3 = vcmask 23552  }
  0x11   :  { %655 = vst.msk [vmem:[%s2644_s1 + $0x108] sm:$0xf] %vm650_vm1, %v1026_v0  ;;  %657 = vst.msk [vmem:[%s2644_s1 + $0x188] sm:$0xf] %vm650_vm1, %v1026_v0  ;;  %v1707_v7 = vld [vmem:[#allocation2 + $0x38] sm:$0xff]  ;;  %v1709_v8 = vld [vmem:[#allocation2 + $0x30] sm:$0xff] }
  0x12   :  { %658 = vst.msk [vmem:[%s2644_s1 + $0x200] sm:$0xff] %vm648_vm0, %v1026_v0  ;;  %660 = vst.msk [vmem:[%s2644_s1 + $0x280] sm:$0xff] %vm648_vm0, %v1026_v0  ;;  %v1715_v9 = vld [vmem:[#allocation2 + $0x48] sm:$0xff]  ;;  %v1717_v10 = vld [vmem:[#allocation2 + $0x40] sm:$0xff]  ;;  %vm599_vm4 = vcmask 89088  }
  0x13   :  { %659 = vst.msk [vmem:[%s2644_s1 + $0x208] sm:$0xf] %vm650_vm1, %v1026_v0  ;;  %661 = vst.msk [vmem:[%s2644_s1 + $0x288] sm:$0xf] %vm650_vm1, %v1026_v0  ;;  %124 = vrot.lane.b32.xlu1 %v1691_v3, %s1027_s28  ;;  %120 = vrot.lane.b32.xlu0 %v1693_v4, %s1027_s28  ;;  %v1723_v11 = vld [vmem:[#allocation2 + $0x58] sm:$0xff]  ;;  %v1725_v12 = vld [vmem:[#allocation2 + $0x50] sm:$0xff] }
  0x14   :  { %662 = vst.msk [vmem:[%s2644_s1 + $0x300] sm:$0xff] %vm648_vm0, %v1026_v0  ;;  %664 = vst.msk [vmem:[%s2644_s1 + $0x380] sm:$0xff] %vm648_vm0, %v1026_v0  ;;  %v1731_v13 = vld [vmem:[#allocation2 + $0x68] sm:$0xff]  ;;  %v1733_v14 = vld [vmem:[#allocation2 + $0x60] sm:$0xff] }
  0x15   :  { %663 = vst.msk [vmem:[%s2644_s1 + $0x308] sm:$0xf] %vm650_vm1, %v1026_v0  ;;  %665 = vst.msk [vmem:[%s2644_s1 + $0x388] sm:$0xf] %vm650_vm1, %v1026_v0  ;;  %v1739_v15 = vld [vmem:[#allocation2 + $0x78] sm:$0xff]  ;;  %v1741_v16 = vld [vmem:[#allocation2 + $0x70] sm:$0xff] }
  0x16   :  { %834 = vst.msk [vmem:[%s2644_s1 + $0x70] sm:$0xff] %vm648_vm0, %v1026_v0  ;;  %836 = vst.msk [vmem:[%s2644_s1 + $0xf0] sm:$0xff] %vm648_vm0, %v1026_v0  ;;  %v1747_v17 = vld [vmem:[#allocation2 + $0x88] sm:$0xff]  ;;  %v1749_v18 = vld [vmem:[#allocation2 + $0x80] sm:$0xff] }
  0x17   :  { %835 = vst.msk [vmem:[%s2644_s1 + $0x78] sm:$0xf] %vm650_vm1, %v1026_v0  ;;  %837 = vst.msk [vmem:[%s2644_s1 + $0xf8] sm:$0xf] %vm650_vm1, %v1026_v0  ;;  %128 = vrot.lane.b32.xlu1 %v1699_v5, %s1027_s28  ;;  %126 = vrot.lane.b32.xlu0 %v1701_v6, %s1027_s28  ;;  %v1755_v19 = vld [vmem:[#allocation2 + $0x98] sm:$0xff]  ;;  %v1757_v20 = vld [vmem:[#allocation2 + $0x90] sm:$0xff] }
  0x18   :  { %838 = vst.msk [vmem:[%s2644_s1 + $0x170] sm:$0xff] %vm648_vm0, %v1026_v0  ;;  %840 = vst.msk [vmem:[%s2644_s1 + $0x1f0] sm:$0xff] %vm648_vm0, %v1026_v0  ;;  %v1763_v21 = vld [vmem:[#allocation2 + $0xa8] sm:$0xff]  ;;  %v1765_v22 = vld [vmem:[#allocation2 + $0xa0] sm:$0xff] }
  0x19   :  { %839 = vst.msk [vmem:[%s2644_s1 + $0x178] sm:$0xf] %vm650_vm1, %v1026_v0  ;;  %841 = vst.msk [vmem:[%s2644_s1 + $0x1f8] sm:$0xf] %vm650_vm1, %v1026_v0  ;;  %v1771_v23 = vld [vmem:[#allocation2 + $0xb8] sm:$0xff]  ;;  %v1773_v24 = vld [vmem:[#allocation2 + $0xb0] sm:$0xff] }
  0x1a   :  { %842 = vst.msk [vmem:[%s2644_s1 + $0x270] sm:$0xff] %vm648_vm0, %v1026_v0  ;;  %844 = vst.msk [vmem:[%s2644_s1 + $0x2f0] sm:$0xff] %vm648_vm0, %v1026_v0  ;;  %v1779_v25 = vld [vmem:[#allocation2 + $0xc8] sm:$0xff]  ;;  %v1781_v26 = vld [vmem:[#allocation2 + $0xc0] sm:$0xff] }
  0x1b   :  { %843 = vst.msk [vmem:[%s2644_s1 + $0x278] sm:$0xf] %vm650_vm1, %v1026_v0  ;;  %845 = vst.msk [vmem:[%s2644_s1 + $0x2f8] sm:$0xf] %vm650_vm1, %v1026_v0  ;;  %132 = vrot.lane.b32.xlu1 %v1707_v7, %s1027_s28  ;;  %130 = vrot.lane.b32.xlu0 %v1709_v8, %s1027_s28  ;;  %v1787_v27 = vld [vmem:[#allocation2 + $0xd8] sm:$0xff]  ;;  %v1789_v28 = vld [vmem:[#allocation2 + $0xd0] sm:$0xff] }
  0x1c   :  { %846 = vst.msk [vmem:[%s2644_s1 + $0x370] sm:$0xff] %vm648_vm0, %v1026_v0  ;;  %848 = vst.msk [vmem:[%s2644_s1 + $0x3f0] sm:$0xff] %vm648_vm0, %v1026_v0  ;;  %v1795_v29 = vld [vmem:[#allocation2 + $0xe8] sm:$0xff]  ;;  %v1797_v30 = vld [vmem:[#allocation2 + $0xe0] sm:$0xff] }
  0x1d   :  { %847 = vst.msk [vmem:[%s2644_s1 + $0x378] sm:$0xf] %vm650_vm1, %v1026_v0  ;;  %849 = vst.msk [vmem:[%s2644_s1 + $0x3f8] sm:$0xf] %vm650_vm1, %v1026_v0  ;;  %v1803_v31 = vld [vmem:[#allocation2 + $0xf8] sm:$0xff]  ;;  %v1805_v32 = vld [vmem:[#allocation2 + $0xf0] sm:$0xff] }
  0x1e   :  { %850 = vst.msk [vmem:[%s2644_s1 + $0x10] sm:$0x3] %vm684_vm2, %v1026_v0  ;;  %851 = vst.msk [vmem:[%s2644_s1 + $0x20] sm:$0x3] %vm684_vm2, %v1026_v0  ;;  %v1811_v33 = vld [vmem:[#allocation2 + $0x108] sm:$0xff]  ;;  %v1813_v34 = vld [vmem:[#allocation2 + $0x100] sm:$0xff] }
  0x1f   :  { %852 = vst.msk [vmem:[%s2644_s1 + $0x30] sm:$0x3] %vm684_vm2, %v1026_v0  ;;  %853 = vst.msk [vmem:[%s2644_s1 + $0x40] sm:$0x3] %vm684_vm2, %v1026_v0  ;;  %136 = vrot.lane.b32.xlu1 %v1715_v9, %s1027_s28  ;;  %134 = vrot.lane.b32.xlu0 %v1717_v10, %s1027_s28  ;;  %v1819_v35 = vld [vmem:[#allocation2 + $0x118] sm:$0xff]  ;;  %v1821_v36 = vld [vmem:[#allocation2 + $0x110] sm:$0xff] }
  0x20   :  { %854 = vst.msk [vmem:[%s2644_s1 + $0x50] sm:$0x3] %vm684_vm2, %v1026_v0  ;;  %855 = vst.msk [vmem:[%s2644_s1 + $0x60] sm:$0x3] %vm684_vm2, %v1026_v0  ;;  %v1827_v37 = vld [vmem:[#allocation2 + $0x128] sm:$0xff]  ;;  %v1829_v38 = vld [vmem:[#allocation2 + $0x120] sm:$0xff] }
  0x21   :  { %856 = vst.msk [vmem:[%s2644_s1 + $0x90] sm:$0x3] %vm684_vm2, %v1026_v0  ;;  %857 = vst.msk [vmem:[%s2644_s1 + $0xa0] sm:$0x3] %vm684_vm2, %v1026_v0  ;;  %v1835_v39 = vld [vmem:[#allocation2 + $0x138] sm:$0xff]  ;;  %v1837_v40 = vld [vmem:[#allocation2 + $0x130] sm:$0xff] }
  0x22   :  { %858 = vst.msk [vmem:[%s2644_s1 + $0xb0] sm:$0x3] %vm684_vm2, %v1026_v0  ;;  %859 = vst.msk [vmem:[%s2644_s1 + $0xc0] sm:$0x3] %vm684_vm2, %v1026_v0  ;;  %v1843_v41 = vld [vmem:[#allocation2 + $0x148] sm:$0xff]  ;;  %v1845_v42 = vld [vmem:[#allocation2 + $0x140] sm:$0xff] }
  0x23   :  { %860 = vst.msk [vmem:[%s2644_s1 + $0xd0] sm:$0x3] %vm684_vm2, %v1026_v0  ;;  %861 = vst.msk [vmem:[%s2644_s1 + $0xe0] sm:$0x3] %vm684_vm2, %v1026_v0  ;;  %140 = vrot.lane.b32.xlu1 %v1723_v11, %s1027_s28  ;;  %138 = vrot.lane.b32.xlu0 %v1725_v12, %s1027_s28  ;;  %v1851_v43 = vld [vmem:[#allocation2 + $0x158] sm:$0xff]  ;;  %v1853_v44 = vld [vmem:[#allocation2 + $0x150] sm:$0xff] }
  0x24   :  { %862 = vst.msk [vmem:[%s2644_s1 + $0x110] sm:$0x3] %vm684_vm2, %v1026_v0  ;;  %863 = vst.msk [vmem:[%s2644_s1 + $0x120] sm:$0x3] %vm684_vm2, %v1026_v0  ;;  %v1859_v45 = vld [vmem:[#allocation2 + $0x168] sm:$0xff]  ;;  %v1861_v46 = vld [vmem:[#allocation2 + $0x160] sm:$0xff] }
  0x25   :  { %864 = vst.msk [vmem:[%s2644_s1 + $0x130] sm:$0x3] %vm684_vm2, %v1026_v0  ;;  %865 = vst.msk [vmem:[%s2644_s1 + $0x140] sm:$0x3] %vm684_vm2, %v1026_v0  ;;  %v1867_v47 = vld [vmem:[#allocation2 + $0x178] sm:$0xff]  ;;  %v1869_v48 = vld [vmem:[#allocation2 + $0x170] sm:$0xff] }
  0x26   :  { %866 = vst.msk [vmem:[%s2644_s1 + $0x150] sm:$0x3] %vm684_vm2, %v1026_v0  ;;  %867 = vst.msk [vmem:[%s2644_s1 + $0x160] sm:$0x3] %vm684_vm2, %v1026_v0 }
  0x27   :  { %868 = vst.msk [vmem:[%s2644_s1 + $0x190] sm:$0x3] %vm684_vm2, %v1026_v0  ;;  %869 = vst.msk [vmem:[%s2644_s1 + $0x1a0] sm:$0x3] %vm684_vm2, %v1026_v0  ;;  %144 = vrot.lane.b32.xlu1 %v1731_v13, %s1027_s28  ;;  %142 = vrot.lane.b32.xlu0 %v1733_v14, %s1027_s28 }
  0x28   :  { %870 = vst.msk [vmem:[%s2644_s1 + $0x1b0] sm:$0x3] %vm684_vm2, %v1026_v0  ;;  %871 = vst.msk [vmem:[%s2644_s1 + $0x1c0] sm:$0x3] %vm684_vm2, %v1026_v0 }
  0x29   :  { %872 = vst.msk [vmem:[%s2644_s1 + $0x1d0] sm:$0x3] %vm684_vm2, %v1026_v0  ;;  %873 = vst.msk [vmem:[%s2644_s1 + $0x1e0] sm:$0x3] %vm684_vm2, %v1026_v0 }
  0x2a   :  { %874 = vst.msk [vmem:[%s2644_s1 + $0x210] sm:$0x3] %vm684_vm2, %v1026_v0  ;;  %875 = vst.msk [vmem:[%s2644_s1 + $0x220] sm:$0x3] %vm684_vm2, %v1026_v0 }
  0x2b   :  { %876 = vst.msk [vmem:[%s2644_s1 + $0x230] sm:$0x3] %vm684_vm2, %v1026_v0  ;;  %877 = vst.msk [vmem:[%s2644_s1 + $0x240] sm:$0x3] %vm684_vm2, %v1026_v0  ;;  %148 = vrot.lane.b32.xlu1 %v1739_v15, %s1027_s28  ;;  %146 = vrot.lane.b32.xlu0 %v1741_v16, %s1027_s28 }
  0x2c   :  { %878 = vst.msk [vmem:[%s2644_s1 + $0x250] sm:$0x3] %vm684_vm2, %v1026_v0  ;;  %879 = vst.msk [vmem:[%s2644_s1 + $0x260] sm:$0x3] %vm684_vm2, %v1026_v0 }
  0x2d   :  { %880 = vst.msk [vmem:[%s2644_s1 + $0x290] sm:$0x3] %vm684_vm2, %v1026_v0  ;;  %881 = vst.msk [vmem:[%s2644_s1 + $0x2a0] sm:$0x3] %vm684_vm2, %v1026_v0 }
  0x2e   :  { %882 = vst.msk [vmem:[%s2644_s1 + $0x2b0] sm:$0x3] %vm684_vm2, %v1026_v0  ;;  %883 = vst.msk [vmem:[%s2644_s1 + $0x2c0] sm:$0x3] %vm684_vm2, %v1026_v0 }
  0x2f   :  { %884 = vst.msk [vmem:[%s2644_s1 + $0x2d0] sm:$0x3] %vm684_vm2, %v1026_v0  ;;  %885 = vst.msk [vmem:[%s2644_s1 + $0x2e0] sm:$0x3] %vm684_vm2, %v1026_v0  ;;  %152 = vrot.lane.b32.xlu1 %v1747_v17, %s1027_s28  ;;  %150 = vrot.lane.b32.xlu0 %v1749_v18, %s1027_s28 }
  0x30   :  { %886 = vst.msk [vmem:[%s2644_s1 + $0x310] sm:$0x3] %vm684_vm2, %v1026_v0  ;;  %887 = vst.msk [vmem:[%s2644_s1 + $0x320] sm:$0x3] %vm684_vm2, %v1026_v0 }
  0x31   :  { %888 = vst.msk [vmem:[%s2644_s1 + $0x330] sm:$0x3] %vm684_vm2, %v1026_v0  ;;  %889 = vst.msk [vmem:[%s2644_s1 + $0x340] sm:$0x3] %vm684_vm2, %v1026_v0 }
  0x32   :  { %890 = vst.msk [vmem:[%s2644_s1 + $0x350] sm:$0x3] %vm684_vm2, %v1026_v0  ;;  %891 = vst.msk [vmem:[%s2644_s1 + $0x360] sm:$0x3] %vm684_vm2, %v1026_v0 }
  0x33   :  { %892 = vst.msk [vmem:[%s2644_s1 + $0x390] sm:$0x3] %vm684_vm2, %v1026_v0  ;;  %893 = vst.msk [vmem:[%s2644_s1 + $0x3a0] sm:$0x3] %vm684_vm2, %v1026_v0  ;;  %156 = vrot.lane.b32.xlu1 %v1755_v19, %s1027_s28  ;;  %154 = vrot.lane.b32.xlu0 %v1757_v20, %s1027_s28 }
  0x34   :  { %894 = vst.msk [vmem:[%s2644_s1 + $0x3b0] sm:$0x3] %vm684_vm2, %v1026_v0  ;;  %895 = vst.msk [vmem:[%s2644_s1 + $0x3c0] sm:$0x3] %vm684_vm2, %v1026_v0 }
  0x35   :  { %896 = vst.msk [vmem:[%s2644_s1 + $0x3d0] sm:$0x3] %vm684_vm2, %v1026_v0  ;;  %897 = vst.msk [vmem:[%s2644_s1 + $0x3e0] sm:$0x3] %vm684_vm2, %v1026_v0 }
  0x36   :  { %898 = vst.msk [vmem:[%s2644_s1 + $0x1a] sm:$0x3] %vm684_vm2, %v1026_v0  ;;  %899 = vst.msk [vmem:[%s2644_s1 + $0x2a] sm:$0x3] %vm684_vm2, %v1026_v0 }
  0x37   :  { %900 = vst.msk [vmem:[%s2644_s1 + $0x3a] sm:$0x3] %vm684_vm2, %v1026_v0  ;;  %901 = vst.msk [vmem:[%s2644_s1 + $0x4a] sm:$0x3] %vm684_vm2, %v1026_v0  ;;  %160 = vrot.lane.b32.xlu1 %v1763_v21, %s1027_s28  ;;  %158 = vrot.lane.b32.xlu0 %v1765_v22, %s1027_s28 }
  0x38   :  { %902 = vst.msk [vmem:[%s2644_s1 + $0x5a] sm:$0x3] %vm684_vm2, %v1026_v0  ;;  %903 = vst.msk [vmem:[%s2644_s1 + $0x6a] sm:$0x3] %vm684_vm2, %v1026_v0 }
  0x39   :  { %904 = vst.msk [vmem:[%s2644_s1 + $0x9a] sm:$0x3] %vm684_vm2, %v1026_v0  ;;  %905 = vst.msk [vmem:[%s2644_s1 + $0xaa] sm:$0x3] %vm684_vm2, %v1026_v0 }
  0x3a   :  { %906 = vst.msk [vmem:[%s2644_s1 + $0xba] sm:$0x3] %vm684_vm2, %v1026_v0  ;;  %907 = vst.msk [vmem:[%s2644_s1 + $0xca] sm:$0x3] %vm684_vm2, %v1026_v0 }
  0x3b   :  { %908 = vst.msk [vmem:[%s2644_s1 + $0xda] sm:$0x3] %vm684_vm2, %v1026_v0  ;;  %909 = vst.msk [vmem:[%s2644_s1 + $0xea] sm:$0x3] %vm684_vm2, %v1026_v0  ;;  %164 = vrot.lane.b32.xlu1 %v1771_v23, %s1027_s28  ;;  %162 = vrot.lane.b32.xlu0 %v1773_v24, %s1027_s28 }
  0x3c   :  { %910 = vst.msk [vmem:[%s2644_s1 + $0x11a] sm:$0x3] %vm684_vm2, %v1026_v0  ;;  %911 = vst.msk [vmem:[%s2644_s1 + $0x12a] sm:$0x3] %vm684_vm2, %v1026_v0 }
  0x3d   :  { %912 = vst.msk [vmem:[%s2644_s1 + $0x13a] sm:$0x3] %vm684_vm2, %v1026_v0  ;;  %913 = vst.msk [vmem:[%s2644_s1 + $0x14a] sm:$0x3] %vm684_vm2, %v1026_v0 }
  0x3e   :  { %914 = vst.msk [vmem:[%s2644_s1 + $0x15a] sm:$0x3] %vm684_vm2, %v1026_v0  ;;  %915 = vst.msk [vmem:[%s2644_s1 + $0x16a] sm:$0x3] %vm684_vm2, %v1026_v0 }
  0x3f   :  { %916 = vst.msk [vmem:[%s2644_s1 + $0x19a] sm:$0x3] %vm684_vm2, %v1026_v0  ;;  %917 = vst.msk [vmem:[%s2644_s1 + $0x1aa] sm:$0x3] %vm684_vm2, %v1026_v0  ;;  %168 = vrot.lane.b32.xlu1 %v1779_v25, %s1027_s28  ;;  %166 = vrot.lane.b32.xlu0 %v1781_v26, %s1027_s28 }
  0x40   :  { %918 = vst.msk [vmem:[%s2644_s1 + $0x1ba] sm:$0x3] %vm684_vm2, %v1026_v0  ;;  %919 = vst.msk [vmem:[%s2644_s1 + $0x1ca] sm:$0x3] %vm684_vm2, %v1026_v0 }
  0x41   :  { %920 = vst.msk [vmem:[%s2644_s1 + $0x1da] sm:$0x3] %vm684_vm2, %v1026_v0  ;;  %921 = vst.msk [vmem:[%s2644_s1 + $0x1ea] sm:$0x3] %vm684_vm2, %v1026_v0 }
  0x42   :  { %922 = vst.msk [vmem:[%s2644_s1 + $0x21a] sm:$0x3] %vm684_vm2, %v1026_v0  ;;  %923 = vst.msk [vmem:[%s2644_s1 + $0x22a] sm:$0x3] %vm684_vm2, %v1026_v0 }
  0x43   :  { %924 = vst.msk [vmem:[%s2644_s1 + $0x23a] sm:$0x3] %vm684_vm2, %v1026_v0  ;;  %925 = vst.msk [vmem:[%s2644_s1 + $0x24a] sm:$0x3] %vm684_vm2, %v1026_v0  ;;  %172 = vrot.lane.b32.xlu1 %v1787_v27, %s1027_s28  ;;  %170 = vrot.lane.b32.xlu0 %v1789_v28, %s1027_s28 }
  0x44   :  { %926 = vst.msk [vmem:[%s2644_s1 + $0x25a] sm:$0x3] %vm684_vm2, %v1026_v0  ;;  %927 = vst.msk [vmem:[%s2644_s1 + $0x26a] sm:$0x3] %vm684_vm2, %v1026_v0 }
  0x45   :  { %928 = vst.msk [vmem:[%s2644_s1 + $0x29a] sm:$0x3] %vm684_vm2, %v1026_v0  ;;  %929 = vst.msk [vmem:[%s2644_s1 + $0x2aa] sm:$0x3] %vm684_vm2, %v1026_v0 }
  0x46   :  { %930 = vst.msk [vmem:[%s2644_s1 + $0x2ba] sm:$0x3] %vm684_vm2, %v1026_v0  ;;  %931 = vst.msk [vmem:[%s2644_s1 + $0x2ca] sm:$0x3] %vm684_vm2, %v1026_v0 }
  0x47   :  { %932 = vst.msk [vmem:[%s2644_s1 + $0x2da] sm:$0x3] %vm684_vm2, %v1026_v0  ;;  %933 = vst.msk [vmem:[%s2644_s1 + $0x2ea] sm:$0x3] %vm684_vm2, %v1026_v0  ;;  %176 = vrot.lane.b32.xlu1 %v1795_v29, %s1027_s28  ;;  %174 = vrot.lane.b32.xlu0 %v1797_v30, %s1027_s28 }
  0x48   :  { %934 = vst.msk [vmem:[%s2644_s1 + $0x31a] sm:$0x3] %vm684_vm2, %v1026_v0  ;;  %935 = vst.msk [vmem:[%s2644_s1 + $0x32a] sm:$0x3] %vm684_vm2, %v1026_v0 }
  0x49   :  { %936 = vst.msk [vmem:[%s2644_s1 + $0x33a] sm:$0x3] %vm684_vm2, %v1026_v0  ;;  %937 = vst.msk [vmem:[%s2644_s1 + $0x34a] sm:$0x3] %vm684_vm2, %v1026_v0 }
  0x4a   :  { %938 = vst.msk [vmem:[%s2644_s1 + $0x35a] sm:$0x3] %vm684_vm2, %v1026_v0  ;;  %939 = vst.msk [vmem:[%s2644_s1 + $0x36a] sm:$0x3] %vm684_vm2, %v1026_v0 }
  0x4b   :  { %940 = vst.msk [vmem:[%s2644_s1 + $0x39a] sm:$0x3] %vm684_vm2, %v1026_v0  ;;  %941 = vst.msk [vmem:[%s2644_s1 + $0x3aa] sm:$0x3] %vm684_vm2, %v1026_v0  ;;  %180 = vrot.lane.b32.xlu1 %v1803_v31, %s1027_s28  ;;  %178 = vrot.lane.b32.xlu0 %v1805_v32, %s1027_s28 }
  0x4c   :  { %942 = vst.msk [vmem:[%s2644_s1 + $0x3ba] sm:$0x3] %vm684_vm2, %v1026_v0  ;;  %943 = vst.msk [vmem:[%s2644_s1 + $0x3ca] sm:$0x3] %vm684_vm2, %v1026_v0 }
  0x4d   :  { %944 = vst.msk [vmem:[%s2644_s1 + $0x3da] sm:$0x3] %vm684_vm2, %v1026_v0  ;;  %945 = vst.msk [vmem:[%s2644_s1 + $0x3ea] sm:$0x3] %vm684_vm2, %v1026_v0 }
  0x4f   :  { %184 = vrot.lane.b32.xlu1 %v1811_v33, %s1027_s28  ;;  %182 = vrot.lane.b32.xlu0 %v1813_v34, %s1027_s28 }
  0x53   :  { %188 = vrot.lane.b32.xlu1 %v1819_v35, %s1027_s28  ;;  %186 = vrot.lane.b32.xlu0 %v1821_v36, %s1027_s28 }
  0x57   :  { %192 = vrot.lane.b32.xlu1 %v1827_v37, %s1027_s28  ;;  %190 = vrot.lane.b32.xlu0 %v1829_v38, %s1027_s28 }
  0x5b   :  { %196 = vrot.lane.b32.xlu1 %v1835_v39, %s1027_s28  ;;  %194 = vrot.lane.b32.xlu0 %v1837_v40, %s1027_s28 }
  0x5f   :  { %200 = vrot.lane.b32.xlu1 %v1843_v41, %s1027_s28  ;;  %198 = vrot.lane.b32.xlu0 %v1845_v42, %s1027_s28 }
  0x63   :  { %204 = vrot.lane.b32.xlu1 %v1851_v43, %s1027_s28  ;;  %202 = vrot.lane.b32.xlu0 %v1853_v44, %s1027_s28 }
  0x67   :  { %208 = vrot.lane.b32.xlu1 %v1859_v45, %s1027_s28  ;;  %206 = vrot.lane.b32.xlu0 %v1861_v46, %s1027_s28 }
  0x6b   :  { %212 = vrot.lane.b32.xlu1 %v1867_v47, %s1027_s28  ;;  %210 = vrot.lane.b32.xlu0 %v1869_v48, %s1027_s28 }
  0x6f   :  { %264 = vrot.lane.b32.xlu1 %v1693_v4, %s1028_s29  ;;  %262 = vrot.lane.b32.xlu0 %v1685_v2, %s1028_s29 }
  0x73   :  { %268 = vrot.lane.b32.xlu1 %v1691_v3, %s1028_s29  ;;  %266 = vrot.lane.b32.xlu0 %v1683_v1, %s1028_s29 }
  0x77   :  { %272 = vrot.lane.b32.xlu1 %v1699_v5, %s1028_s29  ;;  %270 = vrot.lane.b32.xlu0 %v1701_v6, %s1028_s29 }
  0x7b   :  { %276 = vrot.lane.b32.xlu1 %v1707_v7, %s1028_s29  ;;  %274 = vrot.lane.b32.xlu0 %v1709_v8, %s1028_s29 }
  0x7f   :  { %280 = vrot.lane.b32.xlu1 %v1715_v9, %s1028_s29  ;;  %278 = vrot.lane.b32.xlu0 %v1717_v10, %s1028_s29 }
  0x81   :  { %v1895_v49 = vpop.permute.xlu1 %122  ;;  %v1897_v50 = vpop.permute.xlu0 %118 }
  0x83   :  { %284 = vrot.lane.b32.xlu1 %v1723_v11, %s1028_s29  ;;  %282 = vrot.lane.b32.xlu0 %v1725_v12, %s1028_s29 }
  0x85   :  { %v1903_v51 = vpop.permute.xlu1 %124  ;;  %v1905_v52 = vpop.permute.xlu0 %120 }
  0x87   :  { %288 = vrot.lane.b32.xlu1 %v1731_v13, %s1028_s29  ;;  %286 = vrot.lane.b32.xlu0 %v1733_v14, %s1028_s29 }
  0x89   :  { %v1911_v53 = vpop.permute.xlu1 %128  ;;  %v1913_v54 = vpop.permute.xlu0 %126 }
  0x8b   :  { %292 = vrot.lane.b32.xlu1 %v1739_v15, %s1028_s29  ;;  %290 = vrot.lane.b32.xlu0 %v1741_v16, %s1028_s29 }
  0x8d   :  { %v1919_v55 = vpop.permute.xlu1 %132  ;;  %v1921_v56 = vpop.permute.xlu0 %130 }
  0x8f   :  { %296 = vrot.lane.b32.xlu1 %v1747_v17, %s1028_s29  ;;  %294 = vrot.lane.b32.xlu0 %v1749_v18, %s1028_s29 }
  0x91   :  { %v1927_v57 = vpop.permute.xlu1 %136  ;;  %v1929_v58 = vpop.permute.xlu0 %134 }
  0x93   :  { %300 = vrot.lane.b32.xlu1 %v1755_v19, %s1028_s29  ;;  %298 = vrot.lane.b32.xlu0 %v1757_v20, %s1028_s29 }
  0x95   :  { %v1935_v59 = vpop.permute.xlu1 %140  ;;  %v1937_v60 = vpop.permute.xlu0 %138 }
  0x96   :  { %2645 = vst [vmem:[#allocation5_spill] sm:$0xff] %v1937_v60 }
  0x97   :  { %304 = vrot.lane.b32.xlu1 %v1763_v21, %s1028_s29  ;;  %302 = vrot.lane.b32.xlu0 %v1765_v22, %s1028_s29 }
  0x99   :  { %v1943_v61 = vpop.permute.xlu1 %144  ;;  %v1945_v62 = vpop.permute.xlu0 %142 }
  0x9a   :  { %2646 = vst [vmem:[#allocation6_spill] sm:$0xff] %v1943_v61  ;;  %2647 = vst [vmem:[#allocation7_spill] sm:$0xff] %v1945_v62 }
  0x9b   :  { %308 = vrot.lane.b32.xlu1 %v1771_v23, %s1028_s29  ;;  %306 = vrot.lane.b32.xlu0 %v1773_v24, %s1028_s29 }
  0x9d   :  { %v1951_v63 = vpop.permute.xlu1 %148  ;;  %v1953_v0 = vpop.permute.xlu0 %146 }
  0x9e   :  { %2648 = vst [vmem:[#allocation8_spill] sm:$0xff] %v1951_v63  ;;  %2649 = vst [vmem:[#allocation9_spill] sm:$0xff] %v1953_v0 }
  0x9f   :  { %312 = vrot.lane.b32.xlu1 %v1779_v25, %s1028_s29  ;;  %310 = vrot.lane.b32.xlu0 %v1781_v26, %s1028_s29 }
  0xa1   :  { %v1959_v60 = vpop.permute.xlu1 %152  ;;  %v1961_v61 = vpop.permute.xlu0 %150 }
  0xa2   :  { %2650 = vst [vmem:[#allocation10_spill] sm:$0xff] %v1959_v60  ;;  %2651 = vst [vmem:[#allocation11_spill] sm:$0xff] %v1961_v61 }
  0xa3   :  { %316 = vrot.lane.b32.xlu1 %v1787_v27, %s1028_s29  ;;  %314 = vrot.lane.b32.xlu0 %v1789_v28, %s1028_s29 }
  0xa5   :  { %v1967_v62 = vpop.permute.xlu1 %156  ;;  %v1969_v63 = vpop.permute.xlu0 %154 }
  0xa6   :  { %2652 = vst [vmem:[#allocation12_spill] sm:$0xff] %v1967_v62  ;;  %2653 = vst [vmem:[#allocation13_spill] sm:$0xff] %v1969_v63 }
  0xa7   :  { %320 = vrot.lane.b32.xlu1 %v1795_v29, %s1028_s29  ;;  %318 = vrot.lane.b32.xlu0 %v1797_v30, %s1028_s29 }
  0xa9   :  { %v1975_v0 = vpop.permute.xlu1 %160  ;;  %v1977_v60 = vpop.permute.xlu0 %158 }
  0xaa   :  { %2654 = vst [vmem:[#allocation14_spill] sm:$0xff] %v1975_v0  ;;  %2655 = vst [vmem:[#allocation15_spill] sm:$0xff] %v1977_v60 }
  0xab   :  { %324 = vrot.lane.b32.xlu1 %v1803_v31, %s1028_s29  ;;  %322 = vrot.lane.b32.xlu0 %v1805_v32, %s1028_s29 }
  0xad   :  { %v1983_v61 = vpop.permute.xlu1 %164  ;;  %v1985_v62 = vpop.permute.xlu0 %162 }
  0xae   :  { %2656 = vst [vmem:[#allocation16_spill] sm:$0xff] %v1983_v61  ;;  %2657 = vst [vmem:[#allocation17_spill] sm:$0xff] %v1985_v62 }
  0xaf   :  { %328 = vrot.lane.b32.xlu1 %v1811_v33, %s1028_s29  ;;  %326 = vrot.lane.b32.xlu0 %v1813_v34, %s1028_s29 }
  0xb1   :  { %v1991_v63 = vpop.permute.xlu1 %168  ;;  %v1993_v0 = vpop.permute.xlu0 %166 }
  0xb2   :  { %2658 = vst [vmem:[#allocation18_spill] sm:$0xff] %v1991_v63  ;;  %2659 = vst [vmem:[#allocation19_spill] sm:$0xff] %v1993_v0 }
  0xb3   :  { %332 = vrot.lane.b32.xlu1 %v1819_v35, %s1028_s29  ;;  %330 = vrot.lane.b32.xlu0 %v1821_v36, %s1028_s29 }
  0xb5   :  { %v1999_v60 = vpop.permute.xlu1 %172  ;;  %v2001_v61 = vpop.permute.xlu0 %170 }
  0xb6   :  { %2660 = vst [vmem:[#allocation20_spill] sm:$0xff] %v1999_v60  ;;  %2661 = vst [vmem:[#allocation21_spill] sm:$0xff] %v2001_v61 }
  0xb7   :  { %336 = vrot.lane.b32.xlu1 %v1827_v37, %s1028_s29  ;;  %334 = vrot.lane.b32.xlu0 %v1829_v38, %s1028_s29 }
  0xb9   :  { %v2007_v62 = vpop.permute.xlu1 %176  ;;  %v2009_v63 = vpop.permute.xlu0 %174 }
  0xba   :  { %2662 = vst [vmem:[#allocation22_spill] sm:$0xff] %v2007_v62  ;;  %2663 = vst [vmem:[#allocation23_spill] sm:$0xff] %v2009_v63 }
  0xbb   :  { %340 = vrot.lane.b32.xlu1 %v1835_v39, %s1028_s29  ;;  %338 = vrot.lane.b32.xlu0 %v1837_v40, %s1028_s29 }
  0xbd   :  { %v2015_v0 = vpop.permute.xlu1 %180  ;;  %v2017_v60 = vpop.permute.xlu0 %178 }
  0xbe   :  { %2664 = vst [vmem:[#allocation24_spill] sm:$0xff] %v2015_v0  ;;  %2665 = vst [vmem:[#allocation25_spill] sm:$0xff] %v2017_v60 }
  0xbf   :  { %344 = vrot.lane.b32.xlu1 %v1843_v41, %s1028_s29  ;;  %342 = vrot.lane.b32.xlu0 %v1845_v42, %s1028_s29 }
  0xc1   :  { %v2023_v61 = vpop.permute.xlu1 %184  ;;  %v2025_v62 = vpop.permute.xlu0 %182 }
  0xc2   :  { %2666 = vst [vmem:[#allocation26_spill] sm:$0xff] %v2023_v61  ;;  %2667 = vst [vmem:[#allocation27_spill] sm:$0xff] %v2025_v62 }
  0xc3   :  { %348 = vrot.lane.b32.xlu1 %v1851_v43, %s1028_s29  ;;  %346 = vrot.lane.b32.xlu0 %v1853_v44, %s1028_s29 }
  0xc5   :  { %v2031_v63 = vpop.permute.xlu1 %188  ;;  %v2033_v0 = vpop.permute.xlu0 %186 }
  0xc6   :  { %2668 = vst [vmem:[#allocation28_spill] sm:$0xff] %v2031_v63 }
  0xc7   :  { %352 = vrot.lane.b32.xlu1 %v1859_v45, %s1028_s29  ;;  %350 = vrot.lane.b32.xlu0 %v1861_v46, %s1028_s29 }
  0xc9   :  { %v2039_v60 = vpop.permute.xlu1 %192  ;;  %v2041_v61 = vpop.permute.xlu0 %190 }
  0xca   :  { %2669 = vst [vmem:[#allocation29_spill] sm:$0xff] %v2039_v60  ;;  %2670 = vst [vmem:[#allocation30_spill] sm:$0xff] %v2041_v61 }
  0xcb   :  { %356 = vrot.lane.b32.xlu1 %v1867_v47, %s1028_s29  ;;  %354 = vrot.lane.b32.xlu0 %v1869_v48, %s1028_s29 }
  0xcd   :  { %v2047_v62 = vpop.permute.xlu1 %196  ;;  %v2049_v63 = vpop.permute.xlu0 %194 }
  0xce   :  { %2671 = vst [vmem:[#allocation31_spill] sm:$0xff] %v2047_v62  ;;  %2672 = vst [vmem:[#allocation32_spill] sm:$0xff] %v2049_v63 }
  0xcf   :  { %408 = vrot.lane.b32.xlu1 %v1693_v4, %s1029_s30  ;;  %406 = vrot.lane.b32.xlu0 %v1685_v2, %s1029_s30 }
  0xd1   :  { %v2055_v60 = vpop.permute.xlu1 %200  ;;  %v2057_v61 = vpop.permute.xlu0 %198 }
  0xd3   :  { %412 = vrot.lane.b32.xlu1 %v1691_v3, %s1029_s30  ;;  %410 = vrot.lane.b32.xlu0 %v1683_v1, %s1029_s30 }
  0xd5   :  { %v2063_v62 = vpop.permute.xlu1 %204  ;;  %v2065_v63 = vpop.permute.xlu0 %202 }
  0xd6   :  { %2673 = vst [vmem:[#allocation33_spill] sm:$0xff] %v2063_v62  ;;  %2674 = vst [vmem:[#allocation34_spill] sm:$0xff] %v2065_v63 }
  0xd7   :  { %416 = vrot.lane.b32.xlu1 %v1699_v5, %s1029_s30  ;;  %414 = vrot.lane.b32.xlu0 %v1701_v6, %s1029_s30 }
  0xd9   :  { %v2071_v2 = vpop.permute.xlu1 %208  ;;  %v2073_v4 = vpop.permute.xlu0 %206 }
  0xda   :  { %2675 = vst [vmem:[#allocation35_spill] sm:$0xff] %v2071_v2  ;;  %2676 = vst [vmem:[#allocation36_spill] sm:$0xff] %v2073_v4 }
  0xdb   :  { %420 = vrot.lane.b32.xlu1 %v1707_v7, %s1029_s30  ;;  %418 = vrot.lane.b32.xlu0 %v1709_v8, %s1029_s30 }
  0xdd   :  { %v2079_v1 = vpop.permute.xlu1 %212  ;;  %v2081_v3 = vpop.permute.xlu0 %210 }
  0xde   :  { %2677 = vst [vmem:[#allocation37_spill] sm:$0xff] %v2079_v1  ;;  %2678 = vst [vmem:[#allocation38_spill] sm:$0xff] %v2081_v3 }
  0xdf   :  { %424 = vrot.lane.b32.xlu1 %v1715_v9, %s1029_s30  ;;  %422 = vrot.lane.b32.xlu0 %v1717_v10, %s1029_s30 }
  0xe1   :  { %v2087_v5 = vpop.permute.xlu1 %264  ;;  %v2089_v6 = vpop.permute.xlu0 %262 }
  0xe2   :  { %v551_v62 = vsel %vm550_vm3, %v1897_v50, %v2089_v6 }
  0xe3   :  { %428 = vrot.lane.b32.xlu1 %v1723_v11, %s1029_s30  ;;  %426 = vrot.lane.b32.xlu0 %v1725_v12, %s1029_s30 }
  0xe5   :  { %v2095_v7 = vpop.permute.xlu1 %268  ;;  %v2097_v8 = vpop.permute.xlu0 %266 }
  0xe6   :  { %v554_v50 = vsel %vm550_vm3, %v1903_v51, %v2095_v7 }
  0xe7   :  { %432 = vrot.lane.b32.xlu1 %v1731_v13, %s1029_s30  ;;  %430 = vrot.lane.b32.xlu0 %v1733_v14, %s1029_s30 }
  0xe9   :  { %v2103_v9 = vpop.permute.xlu1 %272  ;;  %v2105_v10 = vpop.permute.xlu0 %270 }
  0xea   :  { %v555_v51 = vsel %vm550_vm3, %v1913_v54, %v2105_v10 }
  0xeb   :  { %436 = vrot.lane.b32.xlu1 %v1739_v15, %s1029_s30  ;;  %434 = vrot.lane.b32.xlu0 %v1741_v16, %s1029_s30 }
  0xed   :  { %v2111_v11 = vpop.permute.xlu1 %276  ;;  %v2113_v12 = vpop.permute.xlu0 %274 }
  0xee   :  { %v557_v54 = vsel %vm550_vm3, %v1921_v56, %v2113_v12 }
  0xef   :  { %440 = vrot.lane.b32.xlu1 %v1747_v17, %s1029_s30  ;;  %438 = vrot.lane.b32.xlu0 %v1749_v18, %s1029_s30 }
  0xf1   :  { %v2119_v13 = vpop.permute.xlu1 %280  ;;  %v2121_v14 = vpop.permute.xlu0 %278 }
  0xf2   :  { %v559_v56 = vsel %vm550_vm3, %v1929_v58, %v2121_v14  ;;  %v2683_v58 = vld [vmem:[#allocation5_spill] sm:$0xff] }
  0xf3   :  { %444 = vrot.lane.b32.xlu1 %v1755_v19, %s1029_s30  ;;  %442 = vrot.lane.b32.xlu0 %v1757_v20, %s1029_s30 }
  0xf5   :  { %v2127_v15 = vpop.permute.xlu1 %284  ;;  %v2129_v16 = vpop.permute.xlu0 %282 }
  0xf7   :  { %448 = vrot.lane.b32.xlu1 %v1763_v21, %s1029_s30  ;;  %446 = vrot.lane.b32.xlu0 %v1765_v22, %s1029_s30 }
  0xf9   :  { %v2135_v17 = vpop.permute.xlu1 %288  ;;  %v2137_v18 = vpop.permute.xlu0 %286 }
  0xfb   :  { %452 = vrot.lane.b32.xlu1 %v1771_v23, %s1029_s30  ;;  %450 = vrot.lane.b32.xlu0 %v1773_v24, %s1029_s30 }
  0xfd   :  { %v2143_v19 = vpop.permute.xlu1 %292  ;;  %v2145_v20 = vpop.permute.xlu0 %290 }
  0xff   :  { %456 = vrot.lane.b32.xlu1 %v1779_v25, %s1029_s30  ;;  %454 = vrot.lane.b32.xlu0 %v1781_v26, %s1029_s30 }
 0x101   :  { %v2151_v21 = vpop.permute.xlu1 %296  ;;  %v2153_v22 = vpop.permute.xlu0 %294 }
 0x103   :  { %460 = vrot.lane.b32.xlu1 %v1787_v27, %s1029_s30  ;;  %458 = vrot.lane.b32.xlu0 %v1789_v28, %s1029_s30 }
 0x105   :  { %v2159_v23 = vpop.permute.xlu1 %300  ;;  %v2161_v24 = vpop.permute.xlu0 %298 }
 0x107   :  { %464 = vrot.lane.b32.xlu1 %v1795_v29, %s1029_s30  ;;  %462 = vrot.lane.b32.xlu0 %v1797_v30, %s1029_s30 }
 0x109   :  { %v2167_v25 = vpop.permute.xlu1 %304  ;;  %v2169_v26 = vpop.permute.xlu0 %302 }
 0x10b   :  { %468 = vrot.lane.b32.xlu1 %v1803_v31, %s1029_s30  ;;  %466 = vrot.lane.b32.xlu0 %v1805_v32, %s1029_s30 }
 0x10d   :  { %v2175_v27 = vpop.permute.xlu1 %308  ;;  %v2177_v28 = vpop.permute.xlu0 %306 }
 0x10f   :  { %472 = vrot.lane.b32.xlu1 %v1811_v33, %s1029_s30  ;;  %470 = vrot.lane.b32.xlu0 %v1813_v34, %s1029_s30 }
 0x111   :  { %v2183_v29 = vpop.permute.xlu1 %312  ;;  %v2185_v30 = vpop.permute.xlu0 %310 }
 0x113   :  { %476 = vrot.lane.b32.xlu1 %v1819_v35, %s1029_s30  ;;  %474 = vrot.lane.b32.xlu0 %v1821_v36, %s1029_s30 }
 0x115   :  { %v2191_v31 = vpop.permute.xlu1 %316  ;;  %v2193_v32 = vpop.permute.xlu0 %314 }
 0x117   :  { %480 = vrot.lane.b32.xlu1 %v1827_v37, %s1029_s30  ;;  %478 = vrot.lane.b32.xlu0 %v1829_v38, %s1029_s30 }
 0x119   :  { %v2199_v33 = vpop.permute.xlu1 %320  ;;  %v2201_v34 = vpop.permute.xlu0 %318 }
 0x11b   :  { %484 = vrot.lane.b32.xlu1 %v1835_v39, %s1029_s30  ;;  %482 = vrot.lane.b32.xlu0 %v1837_v40, %s1029_s30 }
 0x11d   :  { %v2207_v35 = vpop.permute.xlu1 %324  ;;  %v2209_v36 = vpop.permute.xlu0 %322 }
 0x11f   :  { %488 = vrot.lane.b32.xlu1 %v1843_v41, %s1029_s30  ;;  %486 = vrot.lane.b32.xlu0 %v1845_v42, %s1029_s30 }
 0x121   :  { %v2215_v37 = vpop.permute.xlu1 %328  ;;  %v2217_v38 = vpop.permute.xlu0 %326 }
 0x123   :  { %492 = vrot.lane.b32.xlu1 %v1851_v43, %s1029_s30  ;;  %490 = vrot.lane.b32.xlu0 %v1853_v44, %s1029_s30 }
 0x125   :  { %v2223_v39 = vpop.permute.xlu1 %332  ;;  %v2225_v40 = vpop.permute.xlu0 %330 }
 0x127   :  { %496 = vrot.lane.b32.xlu1 %v1859_v45, %s1029_s30  ;;  %494 = vrot.lane.b32.xlu0 %v1861_v46, %s1029_s30 }
 0x129   :  { %v2231_v41 = vpop.permute.xlu1 %336  ;;  %v2233_v42 = vpop.permute.xlu0 %334 }
 0x12b   :  { %500 = vrot.lane.b32.xlu1 %v1867_v47, %s1029_s30  ;;  %498 = vrot.lane.b32.xlu0 %v1869_v48, %s1029_s30  ;;  %v552_v48 = vsel %vm550_vm3, %v1905_v52, %v2087_v5  ;;  %v553_v52 = vsel %vm550_vm3, %v1895_v49, %v2097_v8  ;;  %v556_v49 = vsel %vm550_vm3, %v1911_v53, %v2103_v9 }
 0x12c   :  { %v558_v53 = vsel %vm550_vm3, %v1919_v55, %v2111_v11  ;;  %v560_v55 = vsel %vm550_vm3, %v1927_v57, %v2119_v13  ;;  %v562_v57 = vsel %vm550_vm3, %v1935_v59, %v2127_v15  ;;  %v561_v13 = vsel %vm550_vm3, %v2683_v58, %v2129_v16  ;;  %v2684_v59 = vld [vmem:[#allocation6_spill] sm:$0xff]  ;;  %v2685_v16 = vld [vmem:[#allocation7_spill] sm:$0xff] }
 0x12d   :  { %v2239_v43 = vpop.permute.xlu1 %340  ;;  %v2241_v44 = vpop.permute.xlu0 %338  ;;  %v564_v15 = vsel %vm550_vm3, %v2684_v59, %v2135_v17  ;;  %v2686_v17 = vld [vmem:[#allocation8_spill] sm:$0xff] }
 0x131   :  { %v2243_v3 = vpop.permute.xlu1 %344  ;;  %v2245_v45 = vpop.permute.xlu0 %342 }
 0x135   :  { %v2247_v1 = vpop.permute.xlu1 %348  ;;  %v2249_v46 = vpop.permute.xlu0 %346 }
 0x136   :  { %2679 = vst [vmem:[#allocation39_spill] sm:$0xff] %v2247_v1  ;;  %2680 = vst [vmem:[#allocation40_spill] sm:$0xff] %v2249_v46 }
 0x139   :  { %v2251_v4 = vpop.permute.xlu1 %352  ;;  %v2253_v2 = vpop.permute.xlu0 %350 }
 0x13a   :  { %2681 = vst [vmem:[#allocation41_spill] sm:$0xff] %v2251_v4  ;;  %2682 = vst [vmem:[#allocation42_spill] sm:$0xff] %v2253_v2 }
 0x13d   :  { %v2255_v47 = vpop.permute.xlu1 %356  ;;  %v2257_v63 = vpop.permute.xlu0 %354 }
 0x141   :  { %v409_v1 = vpop.permute.xlu1 %408  ;;  %v407_v46 = vpop.permute.xlu0 %406 }
 0x142   :  { %v601_v4 = vsel %vm599_vm4, %v552_v48, %v409_v1  ;;  %v600_v2 = vsel %vm599_vm4, %v551_v62, %v407_v46 }
 0x143   :  { %947 = vst.msk [vmem:[%s2644_s1 + $0x22] sm:$0xff] %vm648_vm0, %v601_v4  ;;  %946 = vst.msk [vmem:[%s2644_s1 + $0x12] sm:$0xff] %vm648_vm0, %v600_v2 }
 0x145   :  { %v413_v1 = vpop.permute.xlu1 %412  ;;  %v411_v62 = vpop.permute.xlu0 %410 }
 0x146   :  { %v603_v5 = vsel %vm599_vm4, %v554_v50, %v413_v1  ;;  %v602_v6 = vsel %vm599_vm4, %v553_v52, %v411_v62 }
 0x147   :  { %949 = vst.msk [vmem:[%s2644_s1 + $0x42] sm:$0xff] %vm648_vm0, %v603_v5  ;;  %948 = vst.msk [vmem:[%s2644_s1 + $0x32] sm:$0xff] %vm648_vm0, %v602_v6  ;;  %v563_v6 = vsel %vm550_vm3, %v2685_v16, %v2137_v18  ;;  %v566_v18 = vsel %vm550_vm3, %v2686_v17, %v2143_v19  ;;  %v2688_v19 = vld [vmem:[#allocation10_spill] sm:$0xff] }
 0x149   :  { %v417_v2 = vpop.permute.xlu1 %416  ;;  %v415_v4 = vpop.permute.xlu0 %414 }
 0x14a   :  { %v605_v7 = vsel %vm599_vm4, %v556_v49, %v417_v2  ;;  %v604_v8 = vsel %vm599_vm4, %v555_v51, %v415_v4 }
 0x14b   :  { %951 = vst.msk [vmem:[%s2644_s1 + $0x62] sm:$0xff] %vm648_vm0, %v605_v7  ;;  %950 = vst.msk [vmem:[%s2644_s1 + $0x52] sm:$0xff] %vm648_vm0, %v604_v8  ;;  %v2687_v7 = vld [vmem:[#allocation9_spill] sm:$0xff] }
 0x14c   :  { %v565_v8 = vsel %vm550_vm3, %v2687_v7, %v2145_v20  ;;  %v568_v20 = vsel %vm550_vm3, %v2688_v19, %v2151_v21  ;;  %v2690_v21 = vld [vmem:[#allocation12_spill] sm:$0xff] }
 0x14d   :  { %v421_v9 = vpop.permute.xlu1 %420  ;;  %v419_v10 = vpop.permute.xlu0 %418 }
 0x14e   :  { %v607_v46 = vsel %vm599_vm4, %v558_v53, %v421_v9  ;;  %v606_v48 = vsel %vm599_vm4, %v557_v54, %v419_v10 }
 0x14f   :  { %953 = vst.msk [vmem:[%s2644_s1 + $0xa2] sm:$0xff] %vm648_vm0, %v607_v46  ;;  %952 = vst.msk [vmem:[%s2644_s1 + $0x92] sm:$0xff] %vm648_vm0, %v606_v48  ;;  %v2689_v46 = vld [vmem:[#allocation11_spill] sm:$0xff] }
 0x150   :  { %v567_v48 = vsel %vm550_vm3, %v2689_v46, %v2153_v22  ;;  %v570_v22 = vsel %vm550_vm3, %v2690_v21, %v2159_v23  ;;  %v2692_v23 = vld [vmem:[#allocation14_spill] sm:$0xff] }
 0x151   :  { %v425_v11 = vpop.permute.xlu1 %424  ;;  %v423_v12 = vpop.permute.xlu0 %422 }
 0x152   :  { %v609_v50 = vsel %vm599_vm4, %v560_v55, %v425_v11  ;;  %v608_v52 = vsel %vm599_vm4, %v559_v56, %v423_v12 }
 0x153   :  { %955 = vst.msk [vmem:[%s2644_s1 + $0xc2] sm:$0xff] %vm648_vm0, %v609_v50  ;;  %954 = vst.msk [vmem:[%s2644_s1 + $0xb2] sm:$0xff] %vm648_vm0, %v608_v52  ;;  %v2691_v50 = vld [vmem:[#allocation13_spill] sm:$0xff] }
 0x154   :  { %v569_v52 = vsel %vm550_vm3, %v2691_v50, %v2161_v24  ;;  %v572_v24 = vsel %vm550_vm3, %v2692_v23, %v2167_v25  ;;  %v2694_v25 = vld [vmem:[#allocation16_spill] sm:$0xff] }
 0x155   :  { %v429_v14 = vpop.permute.xlu1 %428  ;;  %v427_v1 = vpop.permute.xlu0 %426 }
 0x156   :  { %v611_v62 = vsel %vm599_vm4, %v562_v57, %v429_v14  ;;  %v610_v5 = vsel %vm599_vm4, %v561_v13, %v427_v1  ;;  %v2693_v1 = vld [vmem:[#allocation15_spill] sm:$0xff] }
 0x157   :  { %957 = vst.msk [vmem:[%s2644_s1 + $0xe2] sm:$0xff] %vm648_vm0, %v611_v62  ;;  %956 = vst.msk [vmem:[%s2644_s1 + $0xd2] sm:$0xff] %vm648_vm0, %v610_v5  ;;  %v571_v62 = vsel %vm550_vm3, %v2693_v1, %v2169_v26  ;;  %v574_v26 = vsel %vm550_vm3, %v2694_v25, %v2175_v27  ;;  %v2696_v27 = vld [vmem:[#allocation18_spill] sm:$0xff] }
 0x159   :  { %v433_v49 = vpop.permute.xlu1 %432  ;;  %v431_v51 = vpop.permute.xlu0 %430 }
 0x15a   :  { %v613_v2 = vsel %vm599_vm4, %v564_v15, %v433_v49  ;;  %v612_v4 = vsel %vm599_vm4, %v563_v6, %v431_v51  ;;  %v2695_v6 = vld [vmem:[#allocation17_spill] sm:$0xff] }
 0x15b   :  { %959 = vst.msk [vmem:[%s2644_s1 + $0x122] sm:$0xff] %vm648_vm0, %v613_v2  ;;  %958 = vst.msk [vmem:[%s2644_s1 + $0x112] sm:$0xff] %vm648_vm0, %v612_v4  ;;  %v573_v49 = vsel %vm550_vm3, %v2695_v6, %v2177_v28  ;;  %v576_v28 = vsel %vm550_vm3, %v2696_v27, %v2183_v29  ;;  %v2698_v29 = vld [vmem:[#allocation20_spill] sm:$0xff] }
 0x15d   :  { %v437_v53 = vpop.permute.xlu1 %436  ;;  %v435_v54 = vpop.permute.xlu0 %434 }
 0x15e   :  { %v615_v9 = vsel %vm599_vm4, %v566_v18, %v437_v53  ;;  %v614_v10 = vsel %vm599_vm4, %v565_v8, %v435_v54  ;;  %v2697_v18 = vld [vmem:[#allocation19_spill] sm:$0xff] }
 0x15f   :  { %961 = vst.msk [vmem:[%s2644_s1 + $0x142] sm:$0xff] %vm648_vm0, %v615_v9  ;;  %960 = vst.msk [vmem:[%s2644_s1 + $0x132] sm:$0xff] %vm648_vm0, %v614_v10  ;;  %v575_v7 = vsel %vm550_vm3, %v2697_v18, %v2185_v30  ;;  %v578_v30 = vsel %vm550_vm3, %v2698_v29, %v2191_v31  ;;  %v2699_v10 = vld [vmem:[#allocation21_spill] sm:$0xff]  ;;  %v2700_v31 = vld [vmem:[#allocation22_spill] sm:$0xff] }
 0x160   :  { %v577_v19 = vsel %vm550_vm3, %v2699_v10, %v2193_v32  ;;  %v580_v32 = vsel %vm550_vm3, %v2700_v31, %v2199_v33  ;;  %v2702_v33 = vld [vmem:[#allocation24_spill] sm:$0xff] }
 0x161   :  { %v441_v55 = vpop.permute.xlu1 %440  ;;  %v439_v56 = vpop.permute.xlu0 %438 }
 0x162   :  { %v617_v11 = vsel %vm599_vm4, %v568_v20, %v441_v55  ;;  %v616_v12 = vsel %vm599_vm4, %v567_v48, %v439_v56  ;;  %v2701_v56 = vld [vmem:[#allocation23_spill] sm:$0xff] }
 0x163   :  { %963 = vst.msk [vmem:[%s2644_s1 + $0x162] sm:$0xff] %vm648_vm0, %v617_v11  ;;  %962 = vst.msk [vmem:[%s2644_s1 + $0x152] sm:$0xff] %vm648_vm0, %v616_v12  ;;  %v579_v11 = vsel %vm550_vm3, %v2701_v56, %v2201_v34  ;;  %v582_v34 = vsel %vm550_vm3, %v2702_v33, %v2207_v35  ;;  %v2704_v35 = vld [vmem:[#allocation26_spill] sm:$0xff]  ;;  %v2716_v56 = vld [vmem:[#allocation35_spill] sm:$0xff] }
 0x165   :  { %v445_v57 = vpop.permute.xlu1 %444  ;;  %v443_v58 = vpop.permute.xlu0 %442 }
 0x166   :  { %v619_v13 = vsel %vm599_vm4, %v570_v22, %v445_v57  ;;  %v618_v14 = vsel %vm599_vm4, %v569_v52, %v443_v58  ;;  %v2703_v52 = vld [vmem:[#allocation25_spill] sm:$0xff] }
 0x167   :  { %965 = vst.msk [vmem:[%s2644_s1 + $0x1a2] sm:$0xff] %vm648_vm0, %v619_v13  ;;  %964 = vst.msk [vmem:[%s2644_s1 + $0x192] sm:$0xff] %vm648_vm0, %v618_v14  ;;  %v581_v57 = vsel %vm550_vm3, %v2703_v52, %v2209_v36  ;;  %v584_v36 = vsel %vm550_vm3, %v2704_v35, %v2215_v37  ;;  %v2706_v37 = vld [vmem:[#allocation28_spill] sm:$0xff] }
 0x169   :  { %v449_v5 = vpop.permute.xlu1 %448  ;;  %v447_v59 = vpop.permute.xlu0 %446 }
 0x16a   :  { %v621_v15 = vsel %vm599_vm4, %v572_v24, %v449_v5  ;;  %v620_v16 = vsel %vm599_vm4, %v571_v62, %v447_v59  ;;  %v2705_v24 = vld [vmem:[#allocation27_spill] sm:$0xff] }
 0x16b   :  { %967 = vst.msk [vmem:[%s2644_s1 + $0x1c2] sm:$0xff] %vm648_vm0, %v621_v15  ;;  %966 = vst.msk [vmem:[%s2644_s1 + $0x1b2] sm:$0xff] %vm648_vm0, %v620_v16  ;;  %v583_v1 = vsel %vm550_vm3, %v2705_v24, %v2217_v38  ;;  %v586_v38 = vsel %vm550_vm3, %v2706_v37, %v2223_v39  ;;  %v585_v16 = vsel %vm550_vm3, %v2033_v0, %v2225_v40  ;;  %v2707_v39 = vld [vmem:[#allocation29_spill] sm:$0xff]  ;;  %v2708_v40 = vld [vmem:[#allocation30_spill] sm:$0xff] }
 0x16c   :  { %v588_v0 = vsel %vm550_vm3, %v2707_v39, %v2231_v41  ;;  %v2709_v41 = vld [vmem:[#allocation31_spill] sm:$0xff] }
 0x16d   :  { %v453_v51 = vpop.permute.xlu1 %452  ;;  %v451_v2 = vpop.permute.xlu0 %450 }
 0x16e   :  { %v623_v4 = vsel %vm599_vm4, %v574_v26, %v453_v51  ;;  %v622_v17 = vsel %vm599_vm4, %v573_v49, %v451_v2  ;;  %v587_v51 = vsel %vm550_vm3, %v2708_v40, %v2233_v42  ;;  %v590_v42 = vsel %vm550_vm3, %v2709_v41, %v2239_v43 }
 0x16f   :  { %969 = vst.msk [vmem:[%s2644_s1 + $0x1e2] sm:$0xff] %vm648_vm0, %v623_v4  ;;  %968 = vst.msk [vmem:[%s2644_s1 + $0x1d2] sm:$0xff] %vm648_vm0, %v622_v17  ;;  %v592_v43 = vsel %vm550_vm3, %v2055_v60, %v2243_v3  ;;  %v2711_v60 = vld [vmem:[#allocation39_spill] sm:$0xff]  ;;  %v2712_v3 = vld [vmem:[#allocation33_spill] sm:$0xff] }
 0x171   :  { %v457_v8 = vpop.permute.xlu1 %456  ;;  %v455_v53 = vpop.permute.xlu0 %454 }
 0x172   :  { %v625_v54 = vsel %vm599_vm4, %v576_v28, %v457_v8  ;;  %v624_v9 = vsel %vm599_vm4, %v575_v7, %v455_v53  ;;  %v2710_v28 = vld [vmem:[#allocation32_spill] sm:$0xff] }
 0x173   :  { %971 = vst.msk [vmem:[%s2644_s1 + $0x222] sm:$0xff] %vm648_vm0, %v625_v54  ;;  %970 = vst.msk [vmem:[%s2644_s1 + $0x212] sm:$0xff] %vm648_vm0, %v624_v9  ;;  %v589_v18 = vsel %vm550_vm3, %v2710_v28, %v2241_v44  ;;  %v591_v44 = vsel %vm550_vm3, %v2057_v61, %v2245_v45  ;;  %v594_v61 = vsel %vm550_vm3, %v2712_v3, %v2711_v60  ;;  %v2713_v45 = vld [vmem:[#allocation40_spill] sm:$0xff] }
 0x175   :  { %v461_v20 = vpop.permute.xlu1 %460  ;;  %v459_v46 = vpop.permute.xlu0 %458 }
 0x176   :  { %v627_v48 = vsel %vm599_vm4, %v578_v30, %v461_v20  ;;  %v626_v55 = vsel %vm599_vm4, %v577_v19, %v459_v46  ;;  %v2714_v19 = vld [vmem:[#allocation34_spill] sm:$0xff] }
 0x177   :  { %973 = vst.msk [vmem:[%s2644_s1 + $0x242] sm:$0xff] %vm648_vm0, %v627_v48  ;;  %972 = vst.msk [vmem:[%s2644_s1 + $0x232] sm:$0xff] %vm648_vm0, %v626_v55  ;;  %v593_v20 = vsel %vm550_vm3, %v2714_v19, %v2713_v45 }
 0x179   :  { %v465_v12 = vpop.permute.xlu1 %464  ;;  %v463_v21 = vpop.permute.xlu0 %462 }
 0x17a   :  { %v629_v22 = vsel %vm599_vm4, %v580_v32, %v465_v12  ;;  %v628_v50 = vsel %vm599_vm4, %v579_v11, %v463_v21  ;;  %v2715_v32 = vld [vmem:[#allocation41_spill] sm:$0xff]  ;;  %v2717_v12 = vld [vmem:[#allocation42_spill] sm:$0xff]  ;;  %v2718_v21 = vld [vmem:[#allocation36_spill] sm:$0xff] }
 0x17b   :  { %975 = vst.msk [vmem:[%s2644_s1 + $0x262] sm:$0xff] %vm648_vm0, %v629_v22  ;;  %974 = vst.msk [vmem:[%s2644_s1 + $0x252] sm:$0xff] %vm648_vm0, %v628_v50  ;;  %v596_v11 = vsel %vm550_vm3, %v2716_v56, %v2715_v32  ;;  %v595_v22 = vsel %vm550_vm3, %v2718_v21, %v2717_v12 }
 0x17d   :  { %v469_v58 = vpop.permute.xlu1 %468  ;;  %v467_v13 = vpop.permute.xlu0 %466 }
 0x17e   :  { %v631_v14 = vsel %vm599_vm4, %v582_v34, %v469_v58  ;;  %v630_v23 = vsel %vm599_vm4, %v581_v57, %v467_v13  ;;  %v2719_v57 = vld [vmem:[#allocation37_spill] sm:$0xff]  ;;  %v2720_v13 = vld [vmem:[#allocation38_spill] sm:$0xff] }
 0x17f   :  { %977 = vst.msk [vmem:[%s2644_s1 + $0x2a2] sm:$0xff] %vm648_vm0, %v631_v14  ;;  %976 = vst.msk [vmem:[%s2644_s1 + $0x292] sm:$0xff] %vm648_vm0, %v630_v23  ;;  %v598_v58 = vsel %vm550_vm3, %v2719_v57, %v2255_v47  ;;  %v597_v14 = vsel %vm550_vm3, %v2720_v13, %v2257_v63 }
 0x181   :  { %v473_v62 = vpop.permute.xlu1 %472  ;;  %v471_v5 = vpop.permute.xlu0 %470 }
 0x182   :  { %v633_v59 = vsel %vm599_vm4, %v584_v36, %v473_v62  ;;  %v632_v15 = vsel %vm599_vm4, %v583_v1, %v471_v5 }
 0x183   :  { %979 = vst.msk [vmem:[%s2644_s1 + $0x2c2] sm:$0xff] %vm648_vm0, %v633_v59  ;;  %978 = vst.msk [vmem:[%s2644_s1 + $0x2b2] sm:$0xff] %vm648_vm0, %v632_v15 }
 0x185   :  { %v477_v25 = vpop.permute.xlu1 %476  ;;  %v475_v26 = vpop.permute.xlu0 %474 }
 0x186   :  { %v635_v6 = vsel %vm599_vm4, %v586_v38, %v477_v25  ;;  %v634_v49 = vsel %vm599_vm4, %v585_v16, %v475_v26 }
 0x187   :  { %981 = vst.msk [vmem:[%s2644_s1 + $0x2e2] sm:$0xff] %vm648_vm0, %v635_v6  ;;  %980 = vst.msk [vmem:[%s2644_s1 + $0x2d2] sm:$0xff] %vm648_vm0, %v634_v49 }
 0x189   :  { %v481_v2 = vpop.permute.xlu1 %480  ;;  %v479_v4 = vpop.permute.xlu0 %478 }
 0x18a   :  { %v637_v17 = vsel %vm599_vm4, %v588_v0, %v481_v2  ;;  %v636_v27 = vsel %vm599_vm4, %v587_v51, %v479_v4 }
 0x18b   :  { %983 = vst.msk [vmem:[%s2644_s1 + $0x322] sm:$0xff] %vm648_vm0, %v637_v17  ;;  %982 = vst.msk [vmem:[%s2644_s1 + $0x312] sm:$0xff] %vm648_vm0, %v636_v27 }
 0x18d   :  { %v485_v7 = vpop.permute.xlu1 %484  ;;  %v483_v8 = vpop.permute.xlu0 %482 }
 0x18e   :  { %v639_v53 = vsel %vm599_vm4, %v590_v42, %v485_v7  ;;  %v638_v54 = vsel %vm599_vm4, %v589_v18, %v483_v8 }
 0x18f   :  { %985 = vst.msk [vmem:[%s2644_s1 + $0x342] sm:$0xff] %vm648_vm0, %v639_v53  ;;  %984 = vst.msk [vmem:[%s2644_s1 + $0x332] sm:$0xff] %vm648_vm0, %v638_v54 }
 0x191   :  { %v489_v9 = vpop.permute.xlu1 %488  ;;  %v487_v29 = vpop.permute.xlu0 %486 }
 0x192   :  { %v641_v30 = vsel %vm599_vm4, %v592_v43, %v489_v9  ;;  %v640_v10 = vsel %vm599_vm4, %v591_v44, %v487_v29 }
 0x193   :  { %987 = vst.msk [vmem:[%s2644_s1 + $0x362] sm:$0xff] %vm648_vm0, %v641_v30  ;;  %986 = vst.msk [vmem:[%s2644_s1 + $0x352] sm:$0xff] %vm648_vm0, %v640_v10 }
 0x195   :  { %v493_v46 = vpop.permute.xlu1 %492  ;;  %v491_v48 = vpop.permute.xlu0 %490 }
 0x196   :  { %v643_v55 = vsel %vm599_vm4, %v594_v61, %v493_v46  ;;  %v642_v31 = vsel %vm599_vm4, %v593_v20, %v491_v48 }
 0x197   :  { %989 = vst.msk [vmem:[%s2644_s1 + $0x3a2] sm:$0xff] %vm648_vm0, %v643_v55  ;;  %988 = vst.msk [vmem:[%s2644_s1 + $0x392] sm:$0xff] %vm648_vm0, %v642_v31 }
 0x199   :  { %v497_v50 = vpop.permute.xlu1 %496  ;;  %v495_v33 = vpop.permute.xlu0 %494 }
 0x19a   :  { %v645_v34 = vsel %vm599_vm4, %v596_v11, %v497_v50  ;;  %v644_v52 = vsel %vm599_vm4, %v595_v22, %v495_v33 }
 0x19b   :  { %991 = vst.msk [vmem:[%s2644_s1 + $0x3c2] sm:$0xff] %vm648_vm0, %v645_v34  ;;  %990 = vst.msk [vmem:[%s2644_s1 + $0x3b2] sm:$0xff] %vm648_vm0, %v644_v52 }
 0x19d   :  { %v501_v23 = vpop.permute.xlu1 %500  ;;  %v499_v35 = vpop.permute.xlu0 %498 }
 0x19e   :  { %v647_v36 = vsel %vm599_vm4, %v598_v58, %v501_v23  ;;  %v646_v24 = vsel %vm599_vm4, %v597_v14, %v499_v35 }
 0x19f   :  { %993 = vst.msk [vmem:[%s2644_s1 + $0x3e2] sm:$0xff] %vm648_vm0, %v647_v36  ;;  %992 = vst.msk [vmem:[%s2644_s1 + $0x3d2] sm:$0xff] %vm648_vm0, %v646_v24 }
 0x1a0   :  { %833 = vsyncpa [#allocation3], 1 }

</bundles_post_ra>
